<compile_context>
chip_gen: v7x
topology: tpu7x:2x2x1
jax: 0.10.0
libtpu: 0.0.40
codegen_flags: <defaults>
</compile_context>

<pallas_src>
import jax
import jax.numpy as jnp
import numpy as np
from jax.experimental import pallas as pl
from jax.experimental.pallas import tpu as pltpu

NUM_MIDI = 88
NUM_FREQ = 352
DEFAULT_TM = 4096        # row tile; ~14 MiB double-buffered VMEM at f32
MIN_SPLIT_ROWS = 1024    # below this, don't bother splitting for megacore
VMEM_LIMIT_BYTES = 48 << 20


def _round_up(x, m):
    return (x + m - 1) // m * m


def _freq2mid_kernel(ts_ref, w_ref, o_ref):
    # ts_ref: (TM, 352) VMEM row tile
    # w_ref : (352, 88) transposed 0/1 selection matrix, VMEM-resident
    # o_ref : (TM, 88) output tile (full-width last dim -> legal block)
    o_ref[...] = jnp.dot(
        ts_ref[...], w_ref[...], preferred_element_type=jnp.float32
    ).astype(o_ref.dtype)


def make_wmat(dtype=jnp.float32):
    """(88, 352) parameter, identical to the PyTorch __init__."""
    w = np.zeros((NUM_MIDI, NUM_FREQ), dtype=np.float32)
    for i in range(NUM_MIDI):
        w[i, i * 4 + 1] = 1.0
    return jnp.asarray(w, dtype=dtype)


def make_wmat_t(dtype=jnp.float32):
    """(352, 88) transposed weight, built host-side once (compile-time constant)."""
    wt = np.zeros((NUM_FREQ, NUM_MIDI), dtype=np.float32)
    for i in range(NUM_MIDI):
        wt[i * 4 + 1, i] = 1.0
    return jnp.asarray(wt, dtype=dtype)


def _pick_tile(M, tm):
    """Row-tile size: sublane-aligned; >=2 grid steps for non-tiny inputs."""
    if M <= MIN_SPLIT_ROWS:
        return min(tm, _round_up(M, 8))
    # Cap at ceil(M/2) rows so grid_m >= 2 (both v7x TensorCores busy).
    half = _round_up(pl.cdiv(M, 2), 8)
    return min(tm, half)


def freq2mid(ts, wmat_t=None, *, tm=DEFAULT_TM):
    """ts: (B, T, 352) float; wmat_t: (352, 88) or None (use the default
    constant selection matrix). Returns (B, T, 88)."""
    B, T, F = ts.shape
    assert F == NUM_FREQ

    if wmat_t is None:
        wmat_t = make_wmat_t(ts.dtype)
    assert wmat_t.shape == (NUM_FREQ, NUM_MIDI)
    wmat_t = wmat_t.astype(ts.dtype)

    # Flatten batch/time so tiling is independent of the B/T split.
    M = B * T
    ts2 = ts.reshape(M, F)

    tm_eff = _pick_tile(M, tm)
    grid_m = pl.cdiv(M, tm_eff)

    itemsize = jnp.dtype(ts.dtype).itemsize
    cost = pl.CostEstimate(
        flops=2 * M * F * NUM_MIDI,
        transcendentals=0,
        bytes_accessed=(M * F + M * NUM_MIDI + F * NUM_MIDI) * itemsize,
    )

    out2 = pl.pallas_call(
        _freq2mid_kernel,
        out_shape=jax.ShapeDtypeStruct((M, NUM_MIDI), ts.dtype),
        grid_spec=pltpu.PrefetchScalarGridSpec(
            num_scalar_prefetch=0,
            grid=(grid_m,),
            in_specs=[
                pl.BlockSpec((tm_eff, F), lambda m: (m, 0)),
                # constant-index weight block -> stays resident in VMEM
                pl.BlockSpec((F, NUM_MIDI), lambda m: (0, 0)),
            ],
            out_specs=pl.BlockSpec((tm_eff, NUM_MIDI), lambda m: (m, 0)),
        ),
        compiler_params=pltpu.CompilerParams(
            dimension_semantics=("parallel",),
            vmem_limit_bytes=VMEM_LIMIT_BYTES,
        ),
        cost_estimate=cost,
    )(ts2, wmat_t)

    return out2.reshape(B, T, NUM_MIDI)


if __name__ == "__main__":
    key = jax.random.PRNGKey(0)
    B, T = 2, 8
    ts = jax.random.normal(key, (B, T, NUM_FREQ), dtype=jnp.float32)

    out = freq2mid(ts)
    out = jax.block_until_ready(out)

    # reference: out[b, t, i] = ts[b, t, 4*i + 1]
    ref = ts[:, :, 1::4][:, :, :NUM_MIDI]
    np.testing.assert_allclose(np.asarray(out), np.asarray(ref), rtol=1e-6, atol=1e-6)

    assert out.shape == (B, T, NUM_MIDI)
    print("KERNEL_OK")
</pallas_src>

<mosaic_0001>
module attributes {stable_mosaic.version = 11 : i64} {
  func.func @_freq2mid_kernel(%arg0: i32, %arg1: memref<16x352xf32, #tpu.memory_space<vmem>>, %arg2: memref<352x88xf32, #tpu.memory_space<vmem>>, %arg3: memref<16x88xf32, #tpu.memory_space<vmem>>) attributes {dimension_semantics = [#tpu.dimension_semantics<parallel>], iteration_bounds = array<i64: 1>, scalar_prefetch = 0 : i64, scratch_operands = 0 : i64, tpu.core_type = #tpu.core_type<tc>, window_params = [{transform_indices = @transform_0, window_bounds = array<i64: 16, 352>}, {pipeline_mode = #tpu.pipeline_mode<synchronous>, transform_indices = @transform_1, window_bounds = array<i64: 352, 88>}, {transform_indices = @transform_2, window_bounds = array<i64: 16, 88>}]} {
    %c0 = arith.constant 0 : index
    %c0_0 = arith.constant 0 : index
    %0 = vector.load %arg1[%c0, %c0_0] : memref<16x352xf32, #tpu.memory_space<vmem>>, vector<16x352xf32>
    %c0_1 = arith.constant 0 : index
    %c0_2 = arith.constant 0 : index
    %1 = vector.load %arg2[%c0_1, %c0_2] : memref<352x88xf32, #tpu.memory_space<vmem>>, vector<352x88xf32>
    %cst = arith.constant dense<0.000000e+00> : vector<16x88xf32>
    %2 = tpu.matmul %0, %1, %cst {dimension_numbers = #tpu.dot_dimension_numbers<[1], [0], [0], [1], [0, 0, 1, 1], [], []>} : vector<16x352xf32>, vector<352x88xf32>, vector<16x88xf32> -> vector<16x88xf32>
    %c0_3 = arith.constant 0 : index
    %c0_4 = arith.constant 0 : index
    %3 = vector.load %arg3[%c0_3, %c0_4] : memref<16x88xf32, #tpu.memory_space<vmem>>, vector<16x88xf32>
    tpu.vector_store %arg3[%c0_3, %c0_4], %2 {strides = array<i32>} : memref<16x88xf32, #tpu.memory_space<vmem>>, vector<16x88xf32>,
    return
  }
  func.func @transform_0(%arg0: i32) -> (i32, i32) {
    %c0_i32 = arith.constant 0 : i32
    %c0_i32_0 = arith.constant 0 : i32
    return %arg0, %c0_i32 : i32, i32
  }
  func.func @transform_1(%arg0: i32) -> (i32, i32) {
    %c0_i32 = arith.constant 0 : i32
    %c0_i32_0 = arith.constant 0 : i32
    %c0_i32_1 = arith.constant 0 : i32
    return %c0_i32, %c0_i32_0 : i32, i32
  }
  func.func @transform_2(%arg0: i32) -> (i32, i32) {
    %c0_i32 = arith.constant 0 : i32
    %c0_i32_0 = arith.constant 0 : i32
    return %arg0, %c0_i32 : i32, i32
  }
}

</mosaic_0001>

<bundles_post_ra>
// kernel: tpu_custom_call.1
= control target key start
LH: loop header
LB: loop body
LE: loop exit
PB: predicated region body
PF: predicated region fallthrough
CT: control target
= control target key end

     0   :  { %vm62_vm0 = vcmask 785408   ;;  %s584_s0 = inlined_call_operand.vmem [shape: f32[16,352], index: 0, kind: input, shape index: {}]   ;;  %s585_s1 = inlined_call_operand.vmem [shape: f32[352,88], index: 1, kind: input, shape index: {}]   ;;  %s586_s2 = inlined_call_operand.hbm [shape: f32[16,88], index: 2, kind: output, shape index: {}]  }
   0x1   :  { %v34_v0 = vld [vmem:[%s585_s1 + $0x80] sm:$0xff]  ;;  %v35_v1 = vld [vmem:[%s585_s1 + $0x88] sm:$0xff]  ;;  %v36_v5 = vld [vmem:[%s585_s1 + $0x90] sm:$0xff] }
   0x2   :  { %v18_v2 = vld [vmem:[%s585_s1] sm:$0xff]  ;;  %v319_v3 = vpack.c.bf16 %v35_v1, %v34_v0  ;;  %v19_v4 = vld [vmem:[%s585_s1 + $0x8] sm:$0xff]  ;;  %v37_v6 = vld [vmem:[%s585_s1 + $0x98] sm:$0xff] }
   0x3   :  { %v321_v7 = vpack.c.bf16 %v19_v4, %v18_v2  ;;  %v323_v8 = vpack.c.bf16 %v37_v6, %v36_v5  ;;  %v20_v9 = vld [vmem:[%s585_s1 + $0x10] sm:$0xff]  ;;  %v21_v10 = vld [vmem:[%s585_s1 + $0x18] sm:$0xff]  ;;  %v38_v11 = vld [vmem:[%s585_s1 + $0xa0] sm:$0xff] }
   0x4   :  { %320 = vmatprep.subr.bf16.mxu0 %v319_v3  ;;  %v39_v12 = vld [vmem:[%s585_s1 + $0xa8] sm:$0xff]  ;;  %v325_v13 = vpack.c.bf16 %v21_v10, %v20_v9  ;;  %v50_v14 = vld [vmem:[%s585_s1 + $0x100] sm:$0xff]  ;;  %v40_v20 = vld [vmem:[%s585_s1 + $0xb0] sm:$0xff] }
   0x5   :  { %322 = vmatpush3.bf16.msra.mxu0 %v321_v7  ;;  %v51_v15 = vld [vmem:[%s585_s1 + $0x108] sm:$0xff]  ;;  %v327_v16 = vpack.c.bf16 %v39_v12, %v38_v11  ;;  %v22_v17 = vld [vmem:[%s585_s1 + $0x20] sm:$0xff]  ;;  %v41_v21 = vld [vmem:[%s585_s1 + $0xb8] sm:$0xff] }
   0x6   :  { %324 = vmatprep.subr.bf16.mxu0 %v323_v8  ;;  %v23_v18 = vld [vmem:[%s585_s1 + $0x28] sm:$0xff]  ;;  %v351_v19 = vpack.c.bf16 %v51_v15, %v50_v14  ;;  %v52_v22 = vld [vmem:[%s585_s1 + $0x110] sm:$0xff]  ;;  %v53_v23 = vld [vmem:[%s585_s1 + $0x118] sm:$0xff]  ;;  %v331_v28 = vpack.c.bf16 %v41_v21, %v40_v20 }
   0x7   :  { %v355_v24 = vpack.c.bf16 %v53_v23, %v52_v22  ;;  %v329_v25 = vpack.c.bf16 %v23_v18, %v22_v17  ;;  %v54_v26 = vld [vmem:[%s585_s1 + $0x120] sm:$0xff]  ;;  %v55_v27 = vld [vmem:[%s585_s1 + $0x128] sm:$0xff]  ;;  %v24_v29 = vld [vmem:[%s585_s1 + $0x30] sm:$0xff] }
   0x8   :  { %352 = vmatprep.subr.bf16.mxu1 %v351_v19  ;;  %v25_v30 = vld [vmem:[%s585_s1 + $0x38] sm:$0xff]  ;;  %v42_v31 = vld [vmem:[%s585_s1 + $0xc0] sm:$0xff]  ;;  %v359_v32 = vpack.c.bf16 %v55_v27, %v54_v26  ;;  %v43_v33 = vld [vmem:[%s585_s1 + $0xc8] sm:$0xff] }
   0x9   :  { %326 = vmatpush3.bf16.msra.mxu0 %v325_v13  ;;  %354 = vmatpush3.bf16.msra.mxu1 %v351_v19  ;;  %v56_v34 = vld [vmem:[%s585_s1 + $0x130] sm:$0xff]  ;;  %v57_v35 = vld [vmem:[%s585_s1 + $0x138] sm:$0xff]  ;;  %v333_v36 = vpack.c.bf16 %v25_v30, %v24_v29  ;;  %v26_v37 = vld [vmem:[%s585_s1 + $0x40] sm:$0xff]  ;;  %v335_v38 = vpack.c.bf16 %v43_v33, %v42_v31 }
   0xa   :  { %328 = vmatprep.subr.bf16.mxu0 %v327_v16  ;;  %356 = vmatprep.subr.bf16.mxu1 %v355_v24  ;;  %v27_v39 = vld [vmem:[%s585_s1 + $0x48] sm:$0xff]  ;;  %v44_v40 = vld [vmem:[%s585_s1 + $0xd0] sm:$0xff]  ;;  %v45_v41 = vld [vmem:[%s585_s1 + $0xd8] sm:$0xff]  ;;  %v363_v42 = vpack.c.bf16 %v57_v35, %v56_v34 }
   0xb   :  { %v58_v43 = vld [vmem:[%s585_s1 + $0x140] sm:$0xff]  ;;  %v59_v44 = vld [vmem:[%s585_s1 + $0x148] sm:$0xff]  ;;  %v14_v46 = vld [vmem:[%s584_s0 + $0x10] sm:$0xff]  ;;  %v337_v47 = vpack.c.bf16 %v27_v39, %v26_v37 }
   0xc   :  { %v13_v45 = vld [vmem:[%s584_s0 + $0x8] sm:$0xff] }
   0xd   :  { %330 = vmatpush3.bf16.msra.mxu0 %v329_v25  ;;  %358 = vmatpush3.bf16.msra.mxu1 %v355_v24 }
   0xe   :  { %332 = vmatprep.subr.bf16.mxu0 %v331_v28  ;;  %360 = vmatprep.subr.bf16.mxu1 %v359_v32 }
   0xf   :  { %133 = vmatprep.mubr.f32.mxu0 %v13_v45 }
  0x11   :  { %334 = vmatpush3.bf16.msra.mxu0 %v333_v36  ;;  %362 = vmatpush3.bf16.msra.mxu1 %v359_v32 }
  0x12   :  { %7 = vsyncpa [#allocation3], 0  ;;  %336 = vmatprep.subr.bf16.mxu0 %v335_v38  ;;  %v339_v48 = vpack.c.bf16 %v45_v41, %v44_v40  ;;  %v28_v49 = vld [vmem:[%s585_s1 + $0x50] sm:$0xff]  ;;  %v29_v50 = vld [vmem:[%s585_s1 + $0x58] sm:$0xff]  ;;  %364 = vmatprep.subr.bf16.mxu1 %v363_v42  ;;  %v367_v52 = vpack.c.bf16 %v59_v44, %v58_v43  ;;  %vm219_vm1 = vcmask 719872   ;;  %s402_s24 = smov [#allocation2]  }
  0x13   :  { %v46_v51 = vld [vmem:[%s585_s1 + $0xe0] sm:$0xff]  ;;  %v47_v53 = vld [vmem:[%s585_s1 + $0xe8] sm:$0xff]  ;;  %v60_v54 = vld [vmem:[%s585_s1 + $0x150] sm:$0xff]  ;;  %316 = vmatprep.mubr.msk.f32.mxu1 %vm62_vm0, %v14_v46  ;;  %v341_v56 = vpack.c.bf16 %v29_v50, %v28_v49  ;;  %s227_s25 = sshll.u32 %s402_s24, 4  ;;  %s228_s25 = int_to_ptr.vmem [resolvable:$true] %s227_s25 }
  0x14   :  { %v61_v55 = vld [vmem:[%s585_s1 + $0x158] sm:$0xff]  ;;  %v343_v57 = vpack.c.bf16 %v47_v53, %v46_v51  ;;  %v30_v58 = vld [vmem:[%s585_s1 + $0x60] sm:$0xff]  ;;  %v31_v59 = vld [vmem:[%s585_s1 + $0x68] sm:$0xff]  ;;  %s378_s26 = scalar_lea.vmem %s228_s25, 256  ;;  %p383_p1 = scmp.lt.s32.totalorder %s228_s25, %s228_s25 }
  0x15   :  { %338 = vmatpush3.bf16.msra.mxu0 %v337_v47  ;;  %366 = vmatpush3.bf16.msra.mxu1 %v363_v42  ;;  %v371_v60 = vpack.c.bf16 %v61_v55, %v60_v54  ;;  %v48_v61 = vld [vmem:[%s585_s1 + $0xf0] sm:$0xff]  ;;  %v49_v62 = vld [vmem:[%s585_s1 + $0xf8] sm:$0xff]  ;;  %v345_v63 = vpack.c.bf16 %v31_v59, %v30_v58  ;;  %v17_v4 = vld [vmem:[%s584_s0 + $0x28] sm:$0xff]  ;;  %p379_p0 = scmp.ne.s32.totalorder %s228_s25, %s378_s26  ;;  %p384_p2 = scmp.lt.s32.totalorder %s378_s26, %s378_s26 }
  0x16   :  { %340 = vmatprep.subr.bf16.mxu0 %v339_v48  ;;  %368 = vmatprep.subr.bf16.mxu1 %v367_v52  ;;  %v347_v0 = vpack.c.bf16 %v49_v62, %v48_v61  ;;  %v32_v1 = vld [vmem:[%s585_s1 + $0x70] sm:$0xff]  ;;  %v33_v2 = vld [vmem:[%s585_s1 + $0x78] sm:$0xff]  ;;  %v12_v5 = vld [vmem:[%s584_s0] sm:$0xff] }
  0x17   :  { %v349_v3 = vpack.c.bf16 %v33_v2, %v32_v1  ;;  %v16_v6 = vld [vmem:[%s584_s0 + $0x20] sm:$0xff]  ;;  %v15_v7 = vld [vmem:[%s584_s0 + $0x18] sm:$0xff]  ;;  %p385_p3 = por %p384_p2, %p383_p1 }
  0x19   :  { %342 = vmatpush3.bf16.msra.mxu0 %v341_v56  ;;  %370 = vmatpush3.bf16.msra.mxu1 %v367_v52  ;;  %p386_p4 = pnand %p385_p3, %p379_p0 }
  0x1a   :  { %344 = vmatprep.subr.bf16.mxu0 %v343_v57  ;;  %372 = vmatprep.subr.bf16.mxu1 %v371_v60 }
  0x1d   :  { %346 = vmatpush3.bf16.msra.mxu0 %v345_v63  ;;  %374 = vmatpush3.bf16.msra.mxu1 %v371_v60 }
  0x1e   :  { %348 = vmatprep.subr.bf16.mxu0 %v347_v0 }
  0x20   :  { %317 = vmatmul.mubr.msk.f32.vlgmr.msra.gmra.mrb[0].mxu1 %vm62_vm0, %v17_v4 }
  0x21   :  { %350 = vmatpush3.bf16.msra.mxu0 %v349_v3 }
  0x24   :  { %134 = vmatmul.mubr.f32.vlgmr.msra.gmra.mrb[0].mxu0 %v12_v5 }
  0x25   :  { %138 = vmatprep.mubr.f32.mxu0 %v16_v6 }
  0x28   :  { %139 = vmatmul.mubr.f32.gmra.mrb[2].mxu0 %v15_v7 }
  0xf3   :  { %v318_v8 = vpop.f32.mrb[0].mxu1 }
  0xf4   :  { %v210_v9 = vpop.f32.mrb[1].mxu1 }
  0xf7   :  { %v272_v10 = vpop.f32.mrb[0].mxu0 }
  0xf8   :  { %v273_v11 = vpop.f32.mrb[1].mxu0 }
  0xf9   :  { %v274_v12 = vadd.f32 %v273_v11, %v272_v10 }
  0xfb   :  { %v211_v13 = vadd.f32 %v274_v12, %v210_v9  ;;  %v275_v14 = vpop.f32.mrb[2].mxu0 }
  0xfc   :  { %v276_v15 = vpop.f32.mrb[3].mxu0 }
  0xfd   :  { %220 = vst.msk [vmem:[#allocation2] sm:$0xff] %vm219_vm1, %v211_v13  ;;  %v277_v16 = vadd.f32 %v276_v15, %v275_v14 }
  0xff   :  { %v216_v17 = vadd.f32 %v318_v8, %v277_v16 }
 0x101   :  { %221 = vst.msk [vmem:[#allocation2 + $0x8] sm:$0xff] %vm219_vm1, %v216_v17 }
 0x102   :  { %389 = shalt.err (!%p386_p4)
}
 0x103   :  { %s390_s28 = scalar_lea.hbm %s586_s2, 256 }
 0x104   :  { %p391_p5 = scmp.ne.s32.totalorder %s586_s2, %s390_s28  ;;  %p394_p6 = scmp.lt.u32.totalorder %s390_s28, %s586_s2 }
 0x106   :  { %p396_p7 = pnand %p394_p6, %p391_p5 }
 0x108   :  { %399 = shalt.err (!%p396_p7)
}
 0x109   :  { %s403_s5 = smov 128   ;;  %s404_s6 = smov 8  }
 0x10a   :  { %233 = dma.vmem_to_hbm [thread:$0]  %s228_s25, 256, %s586_s2, [#allocation3], %s403_s5, %s403_s5, %s404_s6  }
 0x10b   :  { %400 = dma.done.wait [#allocation3], 256  }
 0x10c   :  { %401 = vsyncadd [#allocation3], 4294967040 }
 0x10d   :  { %237 = vsyncpa [#allocation3], 1 }

</bundles_post_ra>
